<compile_context>
chip_gen: v7x
topology: tpu7x:2x2x1
jax: 0.10.0
libtpu: 0.0.40
codegen_flags: <defaults>
</compile_context>

<pallas_src>
import jax
import jax.numpy as jnp
from jax.experimental import pallas as pl
from jax.experimental.pallas import tpu as pltpu


def _round_up(n, m):
    return ((n + m - 1) // m) * m


def autoencoder_kernel(x_ref, we_ref, be_ref, wd_ref, bd_ref, out_ref):
    """Fused encoder+decoder on one batch tile: out = (x @ We + be) @ Wd + bd."""
    x = x_ref[...]
    encoded = (
        jnp.dot(x, we_ref[...], preferred_element_type=jnp.float32) + be_ref[...]
    )
    decoded = (
        jnp.dot(
            encoded.astype(wd_ref.dtype),
            wd_ref[...],
            preferred_element_type=jnp.float32,
        )
        + bd_ref[...]
    )
    out_ref[...] = decoded.astype(out_ref.dtype)


def autoencoder_forward(x, w_enc, b_enc, w_dec, b_dec, *, block_b=512):
    """
    x:      (B, E)
    w_enc:  (E, H)   (transposed from PyTorch's (H, E))
    b_enc:  (H,) or (1, H)
    w_dec:  (H, E)   (transposed from PyTorch's (E, H))
    b_dec:  (E,) or (1, E)
    returns (B, E)
    """
    B, E = x.shape
    H = w_enc.shape[1]
    dtype = x.dtype

    b_enc = jnp.reshape(b_enc, (1, H))
    b_dec = jnp.reshape(b_dec, (1, E))

    # Lane-dense padding: last dims padded to multiples of 128, batch tile
    # aligned to sublanes (8). Zero padding keeps the math exact.
    E_pad = _round_up(E, 128)
    H_pad = _round_up(H, 128)
    TB = min(block_b, _round_up(B, 8))
    B_pad = _round_up(B, TB)

    x_p = jnp.pad(x, ((0, B_pad - B), (0, E_pad - E)))
    we_p = jnp.pad(w_enc, ((0, E_pad - E), (0, H_pad - H)))
    be_p = jnp.pad(b_enc, ((0, 0), (0, H_pad - H)))
    wd_p = jnp.pad(w_dec, ((0, H_pad - H), (0, E_pad - E)))
    bd_p = jnp.pad(b_dec, ((0, 0), (0, E_pad - E)))

    grid = (B_pad // TB,)

    # x/out tiles walk the batch axis; weights/biases stay resident in VMEM.
    x_spec = pl.BlockSpec((TB, E_pad), lambda i: (i, 0))
    out_spec = pl.BlockSpec((TB, E_pad), lambda i: (i, 0))
    we_spec = pl.BlockSpec((E_pad, H_pad), lambda i: (0, 0))
    be_spec = pl.BlockSpec((1, H_pad), lambda i: (0, 0))
    wd_spec = pl.BlockSpec((H_pad, E_pad), lambda i: (0, 0))
    bd_spec = pl.BlockSpec((1, E_pad), lambda i: (0, 0))

    bytes_per = jnp.dtype(dtype).itemsize
    cost = pl.CostEstimate(
        flops=4 * B_pad * E_pad * H_pad,  # two matmuls: 2*B*E*H each
        transcendentals=0,
        bytes_accessed=bytes_per
        * (2 * B_pad * E_pad + 2 * E_pad * H_pad + H_pad + E_pad),
    )

    out_p = pl.pallas_call(
        autoencoder_kernel,
        out_shape=jax.ShapeDtypeStruct((B_pad, E_pad), dtype),
        grid=grid,
        in_specs=[x_spec, we_spec, be_spec, wd_spec, bd_spec],
        out_specs=out_spec,
        compiler_params=pltpu.CompilerParams(
            dimension_semantics=("parallel",),
        ),
        cost_estimate=cost,
    )(x_p, we_p, be_p, wd_p, bd_p)

    return out_p[:B, :E]


if __name__ == "__main__":
    # Small shapes consistent with the module's forward (x: (batch, embedding_dim)).
    batch = 8
    embedding_dim = 32
    hidden_dim = 16

    key = jax.random.PRNGKey(0)
    kx, kwe, kbe, kwd, kbd = jax.random.split(key, 5)

    x = jax.random.normal(kx, (batch, embedding_dim), dtype=jnp.float32)

    # PyTorch encoder.weight: (hidden, embedding) -> stored transposed (E, H).
    w_enc = jax.random.normal(kwe, (embedding_dim, hidden_dim), dtype=jnp.float32) * 0.1
    b_enc = jax.random.normal(kbe, (hidden_dim,), dtype=jnp.float32) * 0.1
    # PyTorch decoder.weight: (embedding, hidden) -> stored transposed (H, E).
    w_dec = jax.random.normal(kwd, (hidden_dim, embedding_dim), dtype=jnp.float32) * 0.1
    b_dec = jax.random.normal(kbd, (embedding_dim,), dtype=jnp.float32) * 0.1

    out = autoencoder_forward(x, w_enc, b_enc, w_dec, b_dec)
    out = jax.block_until_ready(out)

    # Pure-JAX reference for correctness.
    ref = (x @ w_enc + b_enc[None, :]) @ w_dec + b_dec[None, :]
    assert out.shape == (batch, embedding_dim)
    assert jnp.allclose(out, ref, atol=1e-5, rtol=1e-5)

    print("KERNEL_OK")
</pallas_src>

<mosaic_0001>
module attributes {stable_mosaic.version = 11 : i64} {
  func.func @autoencoder_kernel(%arg0: i32, %arg1: memref<8x128xf32, #tpu.memory_space<vmem>>, %arg2: memref<128x128xf32, #tpu.memory_space<vmem>>, %arg3: memref<1x128xf32, #tpu.memory_space<vmem>>, %arg4: memref<128x128xf32, #tpu.memory_space<vmem>>, %arg5: memref<1x128xf32, #tpu.memory_space<vmem>>, %arg6: memref<8x128xf32, #tpu.memory_space<vmem>>) attributes {dimension_semantics = [#tpu.dimension_semantics<parallel>], iteration_bounds = array<i64: 1>, scalar_prefetch = 0 : i64, scratch_operands = 0 : i64, tpu.core_type = #tpu.core_type<tc>, window_params = [{transform_indices = @transform_0, window_bounds = array<i64: 8, 128>}, {pipeline_mode = #tpu.pipeline_mode<synchronous>, transform_indices = @transform_1, window_bounds = array<i64: 128, 128>}, {pipeline_mode = #tpu.pipeline_mode<synchronous>, transform_indices = @transform_2, window_bounds = array<i64: 1, 128>}, {pipeline_mode = #tpu.pipeline_mode<synchronous>, transform_indices = @transform_3, window_bounds = array<i64: 128, 128>}, {pipeline_mode = #tpu.pipeline_mode<synchronous>, transform_indices = @transform_4, window_bounds = array<i64: 1, 128>}, {transform_indices = @transform_5, window_bounds = array<i64: 8, 128>}]} {
    %c0 = arith.constant 0 : index
    %c0_0 = arith.constant 0 : index
    %0 = vector.load %arg1[%c0, %c0_0] : memref<8x128xf32, #tpu.memory_space<vmem>>, vector<8x128xf32>
    %c0_1 = arith.constant 0 : index
    %c0_2 = arith.constant 0 : index
    %1 = vector.load %arg2[%c0_1, %c0_2] : memref<128x128xf32, #tpu.memory_space<vmem>>, vector<128x128xf32>
    %cst = arith.constant dense<0.000000e+00> : vector<8x128xf32>
    %2 = tpu.matmul %0, %1, %cst {dimension_numbers = #tpu.dot_dimension_numbers<[1], [0], [0], [1], [0, 0, 1, 1], [], []>} : vector<8x128xf32>, vector<128x128xf32>, vector<8x128xf32> -> vector<8x128xf32>
    %c0_3 = arith.constant 0 : index
    %c0_4 = arith.constant 0 : index
    %3 = vector.load %arg3[%c0_3, %c0_4] : memref<1x128xf32, #tpu.memory_space<vmem>>, vector<1x128xf32>
    %4 = vector.broadcast %3 : vector<1x128xf32> to vector<8x128xf32>
    %5 = arith.addf %2, %4 : vector<8x128xf32>
    %c0_5 = arith.constant 0 : index
    %c0_6 = arith.constant 0 : index
    %6 = vector.load %arg4[%c0_5, %c0_6] : memref<128x128xf32, #tpu.memory_space<vmem>>, vector<128x128xf32>
    %cst_7 = arith.constant dense<0.000000e+00> : vector<8x128xf32>
    %7 = tpu.matmul %5, %6, %cst_7 {dimension_numbers = #tpu.dot_dimension_numbers<[1], [0], [0], [1], [0, 0, 1, 1], [], []>} : vector<8x128xf32>, vector<128x128xf32>, vector<8x128xf32> -> vector<8x128xf32>
    %c0_8 = arith.constant 0 : index
    %c0_9 = arith.constant 0 : index
    %8 = vector.load %arg5[%c0_8, %c0_9] : memref<1x128xf32, #tpu.memory_space<vmem>>, vector<1x128xf32>
    %9 = vector.broadcast %8 : vector<1x128xf32> to vector<8x128xf32>
    %10 = arith.addf %7, %9 : vector<8x128xf32>
    %c0_10 = arith.constant 0 : index
    %c0_11 = arith.constant 0 : index
    %11 = vector.load %arg6[%c0_10, %c0_11] : memref<8x128xf32, #tpu.memory_space<vmem>>, vector<8x128xf32>
    tpu.vector_store %arg6[%c0_10, %c0_11], %10 {strides = array<i32>} : memref<8x128xf32, #tpu.memory_space<vmem>>, vector<8x128xf32>,
    return
  }
  func.func @transform_0(%arg0: i32) -> (i32, i32) {
    %c0_i32 = arith.constant 0 : i32
    %c0_i32_0 = arith.constant 0 : i32
    return %arg0, %c0_i32 : i32, i32
  }
  func.func @transform_1(%arg0: i32) -> (i32, i32) {
    %c0_i32 = arith.constant 0 : i32
    %c0_i32_0 = arith.constant 0 : i32
    %c0_i32_1 = arith.constant 0 : i32
    return %c0_i32, %c0_i32_0 : i32, i32
  }
  func.func @transform_2(%arg0: i32) -> (i32, i32) {
    %c0_i32 = arith.constant 0 : i32
    %c0_i32_0 = arith.constant 0 : i32
    %c0_i32_1 = arith.constant 0 : i32
    return %c0_i32, %c0_i32_0 : i32, i32
  }
  func.func @transform_3(%arg0: i32) -> (i32, i32) {
    %c0_i32 = arith.constant 0 : i32
    %c0_i32_0 = arith.constant 0 : i32
    %c0_i32_1 = arith.constant 0 : i32
    return %c0_i32, %c0_i32_0 : i32, i32
  }
  func.func @transform_4(%arg0: i32) -> (i32, i32) {
    %c0_i32 = arith.constant 0 : i32
    %c0_i32_0 = arith.constant 0 : i32
    %c0_i32_1 = arith.constant 0 : i32
    return %c0_i32, %c0_i32_0 : i32, i32
  }
  func.func @transform_5(%arg0: i32) -> (i32, i32) {
    %c0_i32 = arith.constant 0 : i32
    %c0_i32_0 = arith.constant 0 : i32
    return %arg0, %c0_i32 : i32, i32
  }
}

</mosaic_0001>

<bundles_post_ra>
// kernel: tpu_custom_call.1
= control target key start
LH: loop header
LB: loop body
LE: loop exit
PB: predicated region body
PF: predicated region fallthrough
CT: control target
= control target key end

     0   :  { %10 = vsyncpa [#allocation3], 0  ;;  %s636_s0 = inlined_call_operand.hbm [shape: f32[8,128], index: 0, kind: input, shape index: {}]   ;;  %s637_s1 = inlined_call_operand.hbm [shape: f32[128,128], index: 1, kind: input, shape index: {}]   ;;  %s638_s2 = inlined_call_operand.vmem [shape: f32[1,128], index: 2, kind: input, shape index: {}]   ;;  %s639_s3 = inlined_call_operand.hbm [shape: f32[128,128], index: 3, kind: input, shape index: {}]   ;;  %s640_s4 = inlined_call_operand.vmem [shape: f32[1,128], index: 4, kind: input, shape index: {}]   ;;  %s641_s5 = inlined_call_operand.hbm [shape: f32[8,128], index: 5, kind: output, shape index: {}]  }
   0x1   :  { %11 = vsyncpa [#allocation6], 0 }
   0x2   :  { %12 = vsyncpa [#allocation4], 0  ;;  %s521_s18 = smov [#allocation5]   ;;  %s427_s22 = scalar_lea.hbm %s637_s1, 2048 }
   0x3   :  { %s28_s19 = sshll.u32 %s521_s18, 4  ;;  %p428_p0 = scmp.ne.s32.totalorder %s637_s1, %s427_s22  ;;  %s29_s19 = int_to_ptr.vmem [resolvable:$true] %s28_s19 }
   0x4   :  { %p431_p1 = scmp.lt.u32.totalorder %s427_s22, %s637_s1 }
   0x6   :  { %p433_p2 = pnand %p431_p1, %p428_p0 }
   0x8   :  { %436 = shalt.err (!%p433_p2)
}
   0x9   :  { %s437_s27 = scalar_lea.vmem %s29_s19, 2048  ;;  %p442_p4 = scmp.lt.s32.totalorder %s29_s19, %s29_s19 }
   0xa   :  { %p438_p3 = scmp.ne.s32.totalorder %s29_s19, %s437_s27  ;;  %p443_p5 = scmp.lt.s32.totalorder %s437_s27, %s437_s27 }
   0xc   :  { %p444_p6 = por %p443_p5, %p442_p4 }
   0xe   :  { %p445_p7 = pnand %p444_p6, %p438_p3 }
  0x10   :  { %448 = shalt.err (!%p445_p7)
}
  0x11   :  { %s522_s28 = smov 128   ;;  %s523_s29 = smov 8  }
  0x12   :  { %34 = dma.hbm_to_vmem [thread:$0]  %s637_s1, 2048, %s29_s19, [#allocation6], %s522_s28, %s522_s28, %s523_s29  }
  0x13   :  { %s524_s7 = smov [#allocation2]   ;;  %s525_s9 = smov [#allocation7]  }
  0x14   :  { %s19_s8 = sshll.u32 %s524_s7, 4  ;;  %s42_s10 = sshll.u32 %s525_s9, 4  ;;  %s20_s8 = int_to_ptr.vmem [resolvable:$true] %s19_s8  ;;  %s43_s10 = int_to_ptr.vmem [resolvable:$true] %s42_s10 }
  0x15   :  { %s449_s13 = scalar_lea.hbm %s636_s0, 128 }
  0x16   :  { %p450_p8 = scmp.ne.s32.totalorder %s636_s0, %s449_s13  ;;  %p453_p9 = scmp.lt.u32.totalorder %s449_s13, %s636_s0 }
  0x18   :  { %p455_p10 = pnand %p453_p9, %p450_p8 }
  0x1a   :  { %458 = shalt.err (!%p455_p10)
}
  0x1b   :  { %s459_s1 = scalar_lea.vmem %s20_s8, 128  ;;  %p464_p12 = scmp.lt.s32.totalorder %s20_s8, %s20_s8 }
  0x1c   :  { %p460_p11 = scmp.ne.s32.totalorder %s20_s8, %s459_s1  ;;  %p465_p13 = scmp.lt.s32.totalorder %s459_s1, %s459_s1 }
  0x1e   :  { %p466_p0 = por %p465_p13, %p464_p12 }
  0x20   :  { %p467_p1 = pnand %p466_p0, %p460_p11 }
  0x22   :  { %470 = shalt.err (!%p467_p1)
}
  0x23   :  { %22 = dma.hbm_to_vmem [thread:$0]  %s636_s0, 128, %s20_s8, [#allocation3]  }
  0x24   :  { %s471_s22 = scalar_lea.hbm %s639_s3, 2048 }
  0x25   :  { %p472_p2 = scmp.ne.s32.totalorder %s639_s3, %s471_s22  ;;  %p475_p3 = scmp.lt.u32.totalorder %s471_s22, %s639_s3 }
  0x27   :  { %p477_p4 = pnand %p475_p3, %p472_p2 }
  0x29   :  { %480 = shalt.err (!%p477_p4)
}
  0x2a   :  { %s481_s27 = scalar_lea.vmem %s43_s10, 2048  ;;  %p486_p6 = scmp.lt.s32.totalorder %s43_s10, %s43_s10 }
  0x2b   :  { %p482_p5 = scmp.ne.s32.totalorder %s43_s10, %s481_s27  ;;  %p487_p7 = scmp.lt.s32.totalorder %s481_s27, %s481_s27 }
  0x2d   :  { %p488_p8 = por %p487_p7, %p486_p6 }
  0x2f   :  { %p489_p9 = pnand %p488_p8, %p482_p5 }
  0x31   :  { %492 = shalt.err (!%p489_p9)
}
  0x32   :  { %48 = dma.hbm_to_vmem [thread:$0]  %s639_s3, 2048, %s43_s10, [#allocation6], %s522_s28, %s522_s28, %s523_s29  }
  0x33   :  { %515 = dma.done.wait [#allocation3], 128  }
  0x34   :  { %516 = vsyncadd [#allocation3], 4294967168 }
  0x35   :  { %517 = dma.done.wait [#allocation6], 4096  }
  0x36   :  { %518 = vsyncadd [#allocation6], 4294963200  ;;  %v526_v0 = vmov 0.0|0.0   ;;  %vm527_vm0 = vmmov 0   ;;  %v528_v1 = vmov 0.0   ;;  %v61_v2 = vld [vmem:[#allocation5] sm:$0xff] }
  0x37   :  { %370 = vmatprep.subr.bf16.mxu0 %v526_v0  ;;  %332 = vmatprep.mubr.msk.f32.mxu0 %vm527_vm0, %v528_v1  ;;  %v62_v3 = vld [vmem:[#allocation5 + $0x8] sm:$0xff]  ;;  %v63_v4 = vld [vmem:[#allocation5 + $0x10] sm:$0xff]  ;;  %v64_v6 = vld [vmem:[#allocation5 + $0x18] sm:$0xff]  ;;  %s529_s7 = smov [#allocation8]  }
  0x38   :  { %394 = vmatprep.subr.bf16.mxu1 %v526_v0  ;;  %367 = vmatprep.mubr.msk.f32.mxu1 %vm527_vm0, %v528_v1  ;;  %v371_v5 = vpack.c.bf16 %v62_v3, %v61_v2  ;;  %v374_v7 = vpack.c.bf16 %v64_v6, %v63_v4  ;;  %v65_v8 = vld [vmem:[#allocation5 + $0x20] sm:$0xff]  ;;  %v66_v9 = vld [vmem:[#allocation5 + $0x28] sm:$0xff]  ;;  %v156_v12 = vld [vmem:[#allocation7 + $0x10] sm:$0xff]  ;;  %s254_s8 = sshll.u32 %s529_s7, 4  ;;  %s255_s8 = int_to_ptr.vmem [resolvable:$true] %s254_s8 }
  0x39   :  { %v154_v10 = vld [vmem:[#allocation7] sm:$0xff]  ;;  %v155_v11 = vld [vmem:[#allocation7 + $0x8] sm:$0xff]  ;;  %v157_v13 = vld [vmem:[#allocation7 + $0x18] sm:$0xff]  ;;  %v377_v14 = vpack.c.bf16 %v66_v9, %v65_v8  ;;  %s493_s9 = scalar_lea.vmem %s255_s8, 128  ;;  %p498_p11 = scmp.lt.s32.totalorder %s255_s8, %s255_s8 }
  0x3a   :  { %372 = vmatpush3.bf16.msra.mxu0 %v371_v5  ;;  %v395_v15 = vpack.c.bf16 %v155_v11, %v154_v10  ;;  %v67_v16 = vld [vmem:[#allocation5 + $0x30] sm:$0xff]  ;;  %v68_v17 = vld [vmem:[#allocation5 + $0x38] sm:$0xff]  ;;  %v398_v18 = vpack.c.bf16 %v157_v13, %v156_v12  ;;  %v158_v19 = vld [vmem:[#allocation7 + $0x20] sm:$0xff]  ;;  %p494_p10 = scmp.ne.s32.totalorder %s255_s8, %s493_s9  ;;  %p499_p12 = scmp.lt.s32.totalorder %s493_s9, %s493_s9 }
  0x3b   :  { %373 = vmatprep.subr.bf16.mxu0 %v526_v0  ;;  %v159_v20 = vld [vmem:[#allocation7 + $0x28] sm:$0xff]  ;;  %v380_v21 = vpack.c.bf16 %v68_v17, %v67_v16  ;;  %v69_v22 = vld [vmem:[#allocation5 + $0x40] sm:$0xff]  ;;  %v160_v25 = vld [vmem:[#allocation7 + $0x30] sm:$0xff] }
  0x3c   :  { %396 = vmatpush3.bf16.msra.mxu1 %v395_v15  ;;  %v70_v23 = vld [vmem:[#allocation5 + $0x48] sm:$0xff]  ;;  %v401_v24 = vpack.c.bf16 %v159_v20, %v158_v19  ;;  %v161_v26 = vld [vmem:[#allocation7 + $0x38] sm:$0xff]  ;;  %v71_v28 = vld [vmem:[#allocation5 + $0x50] sm:$0xff]  ;;  %p500_p13 = por %p499_p12, %p498_p11 }
  0x3d   :  { %397 = vmatprep.subr.bf16.mxu1 %v526_v0  ;;  %v383_v27 = vpack.c.bf16 %v70_v23, %v69_v22  ;;  %v72_v29 = vld [vmem:[#allocation5 + $0x58] sm:$0xff]  ;;  %v404_v30 = vpack.c.bf16 %v161_v26, %v160_v25  ;;  %v162_v31 = vld [vmem:[#allocation7 + $0x40] sm:$0xff]  ;;  %v163_v32 = vld [vmem:[#allocation7 + $0x48] sm:$0xff] }
  0x3e   :  { %375 = vmatpush3.bf16.msra.mxu0 %v374_v7  ;;  %v386_v33 = vpack.c.bf16 %v72_v29, %v71_v28  ;;  %v73_v34 = vld [vmem:[#allocation5 + $0x60] sm:$0xff]  ;;  %v74_v35 = vld [vmem:[#allocation5 + $0x68] sm:$0xff]  ;;  %v407_v36 = vpack.c.bf16 %v163_v32, %v162_v31  ;;  %v164_v37 = vld [vmem:[#allocation7 + $0x50] sm:$0xff]  ;;  %p501_p0 = pnand %p500_p13, %p494_p10 }
  0x3f   :  { %376 = vmatprep.subr.bf16.mxu0 %v526_v0  ;;  %v165_v38 = vld [vmem:[#allocation7 + $0x58] sm:$0xff]  ;;  %v389_v39 = vpack.c.bf16 %v74_v35, %v73_v34  ;;  %v75_v40 = vld [vmem:[#allocation5 + $0x70] sm:$0xff]  ;;  %v166_v43 = vld [vmem:[#allocation7 + $0x60] sm:$0xff] }
  0x40   :  { %399 = vmatpush3.bf16.msra.mxu1 %v398_v18  ;;  %v76_v41 = vld [vmem:[#allocation5 + $0x78] sm:$0xff]  ;;  %v410_v42 = vpack.c.bf16 %v165_v38, %v164_v37  ;;  %v167_v44 = vld [vmem:[#allocation7 + $0x68] sm:$0xff]  ;;  %v168_v48 = vld [vmem:[#allocation7 + $0x70] sm:$0xff] }
  0x41   :  { %400 = vmatprep.subr.bf16.mxu1 %v526_v0  ;;  %v392_v45 = vpack.c.bf16 %v76_v41, %v75_v40  ;;  %v413_v46 = vpack.c.bf16 %v167_v44, %v166_v43  ;;  %v60_v47 = vld [vmem:[#allocation2] sm:$0xff] }
  0x42   :  { %378 = vmatpush3.bf16.msra.mxu0 %v377_v14  ;;  %v169_v49 = vld [vmem:[#allocation7 + $0x78] sm:$0xff] }
  0x43   :  { %379 = vmatprep.subr.bf16.mxu0 %v526_v0  ;;  %v416_v50 = vpack.c.bf16 %v169_v49, %v168_v48  ;;  %v264_v51 = vld [vmem:[%s638_s2] ss:$0 sm:$0xff] }
  0x44   :  { %402 = vmatpush3.bf16.msra.mxu1 %v401_v24  ;;  %v265_v55 = vld [vmem:[%s640_s4] ss:$0 sm:$0xff] }
  0x45   :  { %403 = vmatprep.subr.bf16.mxu1 %v526_v0 }
  0x46   :  { %381 = vmatpush3.bf16.msra.mxu0 %v380_v21 }
  0x47   :  { %382 = vmatprep.subr.bf16.mxu0 %v526_v0 }
  0x48   :  { %405 = vmatpush3.bf16.msra.mxu1 %v404_v30 }
  0x49   :  { %406 = vmatprep.subr.bf16.mxu1 %v526_v0 }
  0x4a   :  { %384 = vmatpush3.bf16.msra.mxu0 %v383_v27 }
  0x4b   :  { %385 = vmatprep.subr.bf16.mxu0 %v526_v0 }
  0x4c   :  { %408 = vmatpush3.bf16.msra.mxu1 %v407_v36 }
  0x4d   :  { %409 = vmatprep.subr.bf16.mxu1 %v526_v0 }
  0x4e   :  { %387 = vmatpush3.bf16.msra.mxu0 %v386_v33 }
  0x4f   :  { %388 = vmatprep.subr.bf16.mxu0 %v526_v0 }
  0x50   :  { %411 = vmatpush3.bf16.msra.mxu1 %v410_v42 }
  0x51   :  { %412 = vmatprep.subr.bf16.mxu1 %v526_v0 }
  0x52   :  { %390 = vmatpush3.bf16.msra.mxu0 %v389_v39 }
  0x53   :  { %391 = vmatprep.subr.bf16.mxu0 %v526_v0 }
  0x54   :  { %414 = vmatpush3.bf16.msra.mxu1 %v413_v46 }
  0x55   :  { %415 = vmatprep.subr.bf16.mxu1 %v526_v0 }
  0x56   :  { %393 = vmatpush3.bf16.msra.mxu0 %v392_v45 }
  0x58   :  { %417 = vmatpush3.bf16.msra.mxu1 %v416_v50 }
  0x59   :  { %333 = vmatmul.mubr.f32.vlgmr.msra.gmra.mrb[0].mxu0 %v60_v47 }
 0x12c   :  { %v150_v52 = vpop.f32.mrb[0].mxu0 }
 0x12d   :  { %v151_v53 = vadd.f32 %v264_v51, %v150_v52  ;;  %v334_v54 = vpop.f32.mrb[1].mxu0 }
 0x12f   :  { %368 = vmatmul.mubr.f32.vlgmr.msra.gmra.mrb[0].mxu1 %v151_v53 }
 0x202   :  { %v243_v56 = vpop.f32.mrb[0].mxu1 }
 0x203   :  { %v244_v57 = vadd.f32 %v265_v55, %v243_v56  ;;  %v369_v58 = vpop.f32.mrb[1].mxu1 }
 0x205   :  { %247 = vst [vmem:[#allocation8] sm:$0xff] %v244_v57 }
 0x206   :  { %504 = shalt.err (!%p501_p0)
}
 0x207   :  { %s505_s11 = scalar_lea.hbm %s641_s5, 128 }
 0x208   :  { %p506_p1 = scmp.ne.s32.totalorder %s641_s5, %s505_s11  ;;  %p509_p2 = scmp.lt.u32.totalorder %s505_s11, %s641_s5 }
 0x20a   :  { %p511_p3 = pnand %p509_p2, %p506_p1 }
 0x20c   :  { %514 = shalt.err (!%p511_p3)
}
 0x20d   :  { %257 = dma.vmem_to_hbm [thread:$0]  %s255_s8, 128, %s641_s5, [#allocation4]  }
 0x20e   :  { %519 = dma.done.wait [#allocation4], 128  }
 0x20f   :  { %520 = vsyncadd [#allocation4], 4294967168 }
 0x210   :  { %261 = vsyncpa [#allocation3], 1 }
 0x211   :  { %262 = vsyncpa [#allocation6], 1 }
 0x212   :  { %263 = vsyncpa [#allocation4], 1 }

</bundles_post_ra>
